<compile_context>
chip_gen: v6e
topology: v6e:2x2x1
jax: 0.10.0
libtpu: 0.0.40
codegen_flags: <defaults>
</compile_context>

<pallas_src>
import jax
import jax.numpy as jnp
from jax import lax
from jax.experimental import pallas as pl
from jax.experimental.pallas import tpu as pltpu

DIM_IN = 128
HIDDEN = 32
NUM_HEADS = 4


# ----------------------------------------------------------------------------
# Fused kernel: out[h, r] = sum_d W_eff[h, d] * x[r, d] + b_eff[h]
# ----------------------------------------------------------------------------
def _multi_head_kernel(x_ref, w_ref, b_ref, o_ref):
    # x_ref: (TM, 128); w_ref: (4, 128) effective per-head weights (W1_h@W2_h)^T;
    # b_ref: (4, 1); o_ref: (4, TM) lane-dense output block.
    # Contract the feature (last) dim of both operands -> (4, TM); no transpose.
    o_ref[...] = lax.dot_general(
        w_ref[...], x_ref[...],
        dimension_numbers=(((1,), (1,)), ((), ())),
        preferred_element_type=jnp.float32,
    ) + b_ref[...]


def multi_reward_reg_head_forward(x, params):
    """x: (B, S, 128) -> (B, 4, S)."""
    B, S, D = x.shape
    assert D == DIM_IN
    N = B * S
    x2 = x.reshape(N, D)  # trivial collapse, no copy

    # Row tile: up to 512 rows/step (near-roofline for a streaming read), but
    # no larger than needed, rounded to the 128 grain. Ragged final block is
    # handled by masked partial reads/writes -- no pad, no slice.
    TM = min(512, pl.cdiv(N, 128) * 128)

    w_eff_t = params["w_eff_t"]  # (4, 128)
    b_eff = params["b_eff"]      # (4, 1)

    out = pl.pallas_call(
        _multi_head_kernel,
        out_shape=jax.ShapeDtypeStruct((NUM_HEADS, N), jnp.float32),
        grid=(pl.cdiv(N, TM),),
        in_specs=[
            pl.BlockSpec((TM, D), lambda i: (i, 0)),
            pl.BlockSpec((NUM_HEADS, D), lambda i: (0, 0)),
            pl.BlockSpec((NUM_HEADS, 1), lambda i: (0, 0)),
        ],
        out_specs=pl.BlockSpec((NUM_HEADS, TM), lambda i: (0, i)),
        compiler_params=pltpu.CompilerParams(
            dimension_semantics=("parallel",)  # shards rows across v7x's 2 TCs
        ),
    )(x2, w_eff_t, b_eff)                      # (4, N), lane-dense

    # Tiny relayout on 4*N elements (the heavy (N,128) input gets no extra pass).
    return out.reshape(NUM_HEADS, B, S).transpose(1, 0, 2)  # (B, 4, S)


# ----------------------------------------------------------------------------
# Pure-JAX reference (literal per-head two-stage math, same as PyTorch module).
# ----------------------------------------------------------------------------
def reference_forward(x, heads):
    outs = []
    for (w1, b1, w2, b2) in heads:
        hid = x @ w1 + b1            # (B, S, 32)
        o = hid @ w2 + b2            # (B, S, 1)
        outs.append(o[None])         # (1, B, S, 1)
    out = jnp.concatenate(outs, axis=0)          # (4, B, S, 1)
    out = jnp.transpose(out, (1, 0, 2, 3))       # (B, 4, S, 1)
    return jnp.squeeze(out, axis=3)              # (B, 4, S)


# ----------------------------------------------------------------------------
# Parameter construction: per-head params + algebraically collapsed params.
# ----------------------------------------------------------------------------
def make_params(key):
    heads = []
    scale = 0.1
    keys = jax.random.split(key, NUM_HEADS * 4)
    for h in range(NUM_HEADS):
        k1, k2, k3, k4 = keys[4 * h:4 * h + 4]
        w1 = jax.random.uniform(k1, (DIM_IN, HIDDEN), jnp.float32, -scale, scale)
        b1 = jax.random.uniform(k2, (HIDDEN,), jnp.float32, -scale, scale)
        w2 = jax.random.uniform(k3, (HIDDEN, 1), jnp.float32, -scale, scale)
        b2 = jax.random.uniform(k4, (1,), jnp.float32, -scale, scale)
        heads.append((w1, b1, w2, b2))

    # Exact (up to fp reassociation) collapse of the two linears:
    #   out_h = x @ (W1_h @ W2_h) + (b1_h @ W2_h + b2_h)
    w_eff = jnp.concatenate([w1 @ w2 for (w1, _, w2, _) in heads], axis=1)   # (128, 4)
    b_eff = jnp.stack([b1 @ w2[:, 0] + b2[0] for (_, b1, w2, b2) in heads])  # (4,)

    fused = {"w_eff_t": w_eff.T,        # (4, 128): lane-dense row per head
             "b_eff": b_eff[:, None]}   # (4, 1)
    return heads, fused


if __name__ == "__main__":
    # TODO(synk): the PyTorch module's .cuda() device moves have no Pallas
    # equivalent (JAX arrays are already device-placed); only the math is kept.
    B, S = 2, 8  # batch=2, seq=8, feature dim fixed at 128 by the module

    key = jax.random.PRNGKey(0)
    kx, kp = jax.random.split(key)
    x = jax.random.normal(kx, (B, S, DIM_IN), jnp.float32)
    heads, fused = make_params(kp)

    out = multi_reward_reg_head_forward(x, fused)
    out = jax.block_until_ready(out)
    assert out.shape == (B, NUM_HEADS, S), out.shape

    ref = reference_forward(x, heads)
    ref = jax.block_until_ready(ref)
    assert jnp.allclose(out, ref, atol=1e-4, rtol=1e-4), "mismatch vs JAX reference"

    print("KERNEL_OK")
</pallas_src>

<mosaic_0001>
module attributes {stable_mosaic.version = 11 : i64} {
  func.func @_multi_head_kernel(%arg0: i32, %arg1: memref<128x128xf32, #tpu.memory_space<vmem>>, %arg2: memref<4x128xf32, #tpu.memory_space<vmem>>, %arg3: memref<4x1xf32, #tpu.memory_space<vmem>>, %arg4: memref<4x128xf32, #tpu.memory_space<vmem>>) attributes {dimension_semantics = [#tpu.dimension_semantics<parallel>], iteration_bounds = array<i64: 1>, scalar_prefetch = 0 : i64, scratch_operands = 0 : i64, tpu.core_type = #tpu.core_type<tc>, window_params = [{transform_indices = @transform_0, window_bounds = array<i64: 128, 128>}, {pipeline_mode = #tpu.pipeline_mode<synchronous>, transform_indices = @transform_1, window_bounds = array<i64: 4, 128>}, {pipeline_mode = #tpu.pipeline_mode<synchronous>, transform_indices = @transform_2, window_bounds = array<i64: 4, 1>}, {transform_indices = @transform_3, window_bounds = array<i64: 4, 128>}]} {
    %c0 = arith.constant 0 : index
    %c0_0 = arith.constant 0 : index
    %0 = vector.load %arg2[%c0, %c0_0] : memref<4x128xf32, #tpu.memory_space<vmem>>, vector<4x128xf32>
    %c0_1 = arith.constant 0 : index
    %c0_2 = arith.constant 0 : index
    %1 = vector.load %arg1[%c0_1, %c0_2] : memref<128x128xf32, #tpu.memory_space<vmem>>, vector<128x128xf32>
    %cst = arith.constant dense<0.000000e+00> : vector<4x128xf32>
    %2 = tpu.matmul %0, %1, %cst {dimension_numbers = #tpu.dot_dimension_numbers<[1], [1], [0], [0], [0, 0, 1, 0], [], []>} : vector<4x128xf32>, vector<128x128xf32>, vector<4x128xf32> -> vector<4x128xf32>
    %c0_3 = arith.constant 0 : index
    %c0_4 = arith.constant 0 : index
    %3 = vector.load %arg3[%c0_3, %c0_4] : memref<4x1xf32, #tpu.memory_space<vmem>>, vector<4x1xf32>
    %4 = vector.broadcast %3 : vector<4x1xf32> to vector<4x128xf32>
    %5 = arith.addf %2, %4 : vector<4x128xf32>
    %c0_5 = arith.constant 0 : index
    %c0_6 = arith.constant 0 : index
    %6 = vector.load %arg4[%c0_5, %c0_6] : memref<4x128xf32, #tpu.memory_space<vmem>>, vector<4x128xf32>
    tpu.vector_store %arg4[%c0_5, %c0_6], %5 {strides = array<i32>} : memref<4x128xf32, #tpu.memory_space<vmem>>, vector<4x128xf32>,
    return
  }
  func.func @transform_0(%arg0: i32) -> (i32, i32) {
    %c0_i32 = arith.constant 0 : i32
    %c0_i32_0 = arith.constant 0 : i32
    return %arg0, %c0_i32 : i32, i32
  }
  func.func @transform_1(%arg0: i32) -> (i32, i32) {
    %c0_i32 = arith.constant 0 : i32
    %c0_i32_0 = arith.constant 0 : i32
    %c0_i32_1 = arith.constant 0 : i32
    return %c0_i32, %c0_i32_0 : i32, i32
  }
  func.func @transform_2(%arg0: i32) -> (i32, i32) {
    %c0_i32 = arith.constant 0 : i32
    %c0_i32_0 = arith.constant 0 : i32
    %c0_i32_1 = arith.constant 0 : i32
    return %c0_i32, %c0_i32_0 : i32, i32
  }
  func.func @transform_3(%arg0: i32) -> (i32, i32) {
    %c0_i32 = arith.constant 0 : i32
    %c0_i32_0 = arith.constant 0 : i32
    return %c0_i32, %arg0 : i32, i32
  }
}

</mosaic_0001>

<bundles_post_ra>
// kernel: tpu_custom_call.1
= control target key start
LH: loop header
LB: loop body
LE: loop exit
PB: predicated region body
PF: predicated region fallthrough
CT: control target
= control target key end

     0   :  { %8 = vsyncpa [#allocation3], 0  ;;  %s281_s0 = inlined_call_operand.hbm [shape: f32[16,128], index: 0, kind: input, shape index: {}]   ;;  %s282_s1 = inlined_call_operand.vmem [shape: f32[4,128], index: 1, kind: input, shape index: {}]   ;;  %s283_s2 = inlined_call_operand.vmem [shape: f32[4,1], index: 2, kind: input, shape index: {}]   ;;  %s284_s3 = inlined_call_operand.hbm [shape: f32[4,16], index: 3, kind: output, shape index: {}]  }
   0x1   :  { %9 = vsyncpa [#allocation4], 0 }
   0x2   :  { %14 = vsyncadd [#allocation3], 1792  ;;  %s242_s12 = smov [#allocation2]  }
   0x3   :  { %s15_s13 = sshll.u32 %s242_s12, 4  ;;  %s16_s13 = int_to_ptr.vmem [resolvable:$true] %s15_s13 }
   0x4   :  { %s206_s14 = scalar_lea.vmem %s16_s13, 256  ;;  %s210_s15 = scalar_lea.vmem %s16_s13, 2048 }
   0x5   :  { %p207_p0 = scmp.ne.s32.totalorder %s16_s13, %s206_s14  ;;  %p211_p1 = scmp.lt.s32.totalorder %s16_s13, %s16_s13 }
   0x6   :  { %p212_p2 = scmp.lt.s32.totalorder %s210_s15, %s206_s14 }
   0x8   :  { %p213_p3 = por %p212_p2, %p211_p1 }
   0xa   :  { %p214_p4 = pnand %p213_p3, %p207_p0 }
   0xc   :  { %217 = shalt.err (!%p214_p4)
}
   0xd   :  { %s243_s16 = smov 128   ;;  %s244_s17 = smov 8  }
   0xe   :  { %21 = dma.hbm_to_vmem [thread:$0]  %s281_s0, 256, %s16_s13, [#allocation3], %s243_s16, %s243_s16, %s244_s17  }
   0xf   :  { %238 = dma.done.wait [#allocation3], 2048  }
  0x10   :  { %239 = vsyncadd [#allocation3], 4294965248  ;;  %v245_v0 = vmov 0.0   ;;  %vm246_vm0 = vmmov 0   ;;  %v247_v1 = vmov 0   ;;  %v45_v2 = vld [vmem:[#allocation2 + $0x78] sm:$0xff] }
  0x11   :  { %155 = vmatprep.subr.mxu0 %v245_v0  ;;  %187 = vmatprep.mubr.msk.f32.mxu0 %vm246_vm0, %v245_v0  ;;  %v44_v3 = vld [vmem:[#allocation2 + $0x70] sm:$0xff]  ;;  %v46_v4 = vld [vmem:[%s283_s2] sm:$0xf]  ;;  %v43_v5 = vld [vmem:[#allocation2 + $0x68] sm:$0xff]  ;;  %s248_s22 = smov [#allocation5]  }
  0x12   :  { %197 = vset.pattern.permute.xlu0 %v247_v1  ;;  %156 = vmatpush3.xpose.msra.mxu0 %v45_v2  ;;  %v42_v6 = vld [vmem:[#allocation2 + $0x60] sm:$0xff]  ;;  %v41_v7 = vld [vmem:[#allocation2 + $0x58] sm:$0xff]  ;;  %v40_v8 = vld [vmem:[#allocation2 + $0x50] sm:$0xff]  ;;  %s129_s23 = sshll.u32 %s248_s22, 4  ;;  %s130_s23 = int_to_ptr.vmem [resolvable:$true] %s129_s23 }
  0x13   :  { %157 = vmatprep.subr.mxu0 %v245_v0  ;;  %49 = vperm.xlu0 %197, %v46_v4   ;;  %v39_v9 = vld [vmem:[#allocation2 + $0x48] sm:$0xff]  ;;  %v38_v10 = vld [vmem:[#allocation2 + $0x40] sm:$0xff]  ;;  %v37_v11 = vld [vmem:[#allocation2 + $0x38] sm:$0xff]  ;;  %s218_s24 = scalar_lea.vmem %s130_s23, 64  ;;  %p223_p6 = scmp.lt.s32.totalorder %s130_s23, %s130_s23 }
  0x14   :  { %v36_v12 = vld [vmem:[#allocation2 + $0x30] sm:$0xff]  ;;  %v35_v13 = vld [vmem:[#allocation2 + $0x28] sm:$0xff]  ;;  %v34_v14 = vld [vmem:[#allocation2 + $0x20] sm:$0xff]  ;;  %p219_p5 = scmp.ne.s32.totalorder %s130_s23, %s218_s24  ;;  %p224_p7 = scmp.lt.s32.totalorder %s218_s24, %s218_s24 }
  0x15   :  { %v33_v15 = vld [vmem:[#allocation2 + $0x18] sm:$0xff]  ;;  %v32_v16 = vld [vmem:[#allocation2 + $0x10] sm:$0xff]  ;;  %v31_v17 = vld [vmem:[#allocation2 + $0x8] sm:$0xff] }
  0x16   :  { %158 = vmatpush3.xpose.msra.mxu0 %v44_v3  ;;  %v30_v18 = vld [vmem:[#allocation2] sm:$0xff]  ;;  %p225_p8 = por %p224_p7, %p223_p6 }
  0x17   :  { %159 = vmatprep.subr.mxu0 %v245_v0  ;;  %v29_v19 = vld [vmem:[%s282_s1] sm:$0xf] }
  0x18   :  { %p226_p9 = pnand %p225_p8, %p219_p5 }
  0x1a   :  { %160 = vmatpush3.xpose.msra.mxu0 %v43_v5 }
  0x1b   :  { %161 = vmatprep.subr.mxu0 %v245_v0 }
  0x1e   :  { %162 = vmatpush3.xpose.msra.mxu0 %v42_v6 }
  0x1f   :  { %163 = vmatprep.subr.mxu0 %v245_v0 }
  0x22   :  { %164 = vmatpush3.xpose.msra.mxu0 %v41_v7 }
  0x23   :  { %165 = vmatprep.subr.mxu0 %v245_v0 }
  0x26   :  { %166 = vmatpush3.xpose.msra.mxu0 %v40_v8 }
  0x27   :  { %167 = vmatprep.subr.mxu0 %v245_v0 }
  0x2a   :  { %168 = vmatpush3.xpose.msra.mxu0 %v39_v9 }
  0x2b   :  { %169 = vmatprep.subr.mxu0 %v245_v0 }
  0x2e   :  { %170 = vmatpush3.xpose.msra.mxu0 %v38_v10 }
  0x2f   :  { %171 = vmatprep.subr.mxu0 %v245_v0 }
  0x32   :  { %172 = vmatpush3.xpose.msra.mxu0 %v37_v11 }
  0x33   :  { %173 = vmatprep.subr.mxu0 %v245_v0 }
  0x36   :  { %174 = vmatpush3.xpose.msra.mxu0 %v36_v12 }
  0x37   :  { %175 = vmatprep.subr.mxu0 %v245_v0 }
  0x3a   :  { %176 = vmatpush3.xpose.msra.mxu0 %v35_v13 }
  0x3b   :  { %177 = vmatprep.subr.mxu0 %v245_v0 }
  0x3e   :  { %178 = vmatpush3.xpose.msra.mxu0 %v34_v14 }
  0x3f   :  { %179 = vmatprep.subr.mxu0 %v245_v0 }
  0x42   :  { %180 = vmatpush3.xpose.msra.mxu0 %v33_v15 }
  0x43   :  { %181 = vmatprep.subr.mxu0 %v245_v0 }
  0x46   :  { %182 = vmatpush3.xpose.msra.mxu0 %v32_v16 }
  0x47   :  { %183 = vmatprep.subr.mxu0 %v245_v0 }
  0x4a   :  { %184 = vmatpush3.xpose.msra.mxu0 %v31_v17 }
  0x4b   :  { %185 = vmatprep.subr.mxu0 %v245_v0 }
  0x4e   :  { %186 = vmatpush3.xpose.msra.mxu0 %v30_v18 }
  0x51   :  { %188 = vmatmul.mubr.f32.vlgmr.msra.gmra.mxu0 %v29_v19 }
  0x8e   :  { %v50_v20 = vpop.permute.xlu0 %49 }
 0x111   :  { %v118_v21 = vpop.f32.mrf.mxu0 }
 0x112   :  { %v119_v22 = vadd.f32 %v118_v21, %v50_v20 }
 0x113   :  { %v189_v23 = vpop.f32.mrf.mxu0 }
 0x114   :  { %122 = vst [vmem:[#allocation5] sm:$0xf] %v119_v22 }
 0x115   :  { %229 = shalt.err (!%p226_p9)
}
 0x116   :  { %132 = dma.vmem_to_hbm [thread:$0]  %s130_s23, 64, %s284_s3, [#allocation4]  }
 0x117   :  { %240 = dma.done.wait [#allocation4], 64  }
 0x118   :  { %241 = vsyncadd [#allocation4], 4294967232 }
 0x119   :  { %136 = vsyncpa [#allocation3], 1 }
 0x11a   :  { %137 = vsyncpa [#allocation4], 1 }

</bundles_post_ra>
